<compile_context>
chip_gen: v5e
topology: v5e:2x2
jax: 0.10.0
libtpu: 0.0.40
codegen_flags: <defaults>
</compile_context>

<pallas_src>
import jax
import jax.numpy as jnp
from jax.experimental import pallas as pl
from jax.experimental.pallas import tpu as pltpu

# ----------------------------- configuration (small shapes) ------------------
HIDDEN_DIM = 32          # args.hidden_dim
NUM_QUERIES = 8          # args.num_queries
NUM_CLASSES = 4          # args.num_classes -> cls head outputs NUM_CLASSES + 1
NUM_DEC_LAYERS = 2       # hs.shape[0] (decoder layers returned by the neck)
BATCH = 2
START_CHANNELS = 8       # args.start_channels (seg head in_channels)
NUM_ORGANS = 4           # args.fg_bg == False -> seg out_channels = NUM_ORGANS + 1
SEG_SPATIAL = (4, 4, 8)  # D, H, W of backbone 'P0' feature map (N = 128 voxels)
EPS = 1e-5               # inverse_sigmoid eps


# ----------------------------- fused Pallas kernel ----------------------------
def _make_fused_kernel(hidden_dim, batch):
    """hidden_dim = H (static), batch = seg batch size (static)."""

    def kernel(hs_ref, ref_ref,
               w1cls_ref, b1cls_ref, w2_ref, b2_ref, w3_ref, b3_ref,
               xseg_ref, wseg_ref, bseg_ref,
               logits_ref, boxes_ref, seg_ref):
        # ---------------- detection path (cls head + bbox MLP) --------------
        hs = hs_ref[...]                                             # (rows, H) bf16

        # Fused [bbox-MLP layer 1 | cls head]: single (rows,H)x(H,H+C1) dot.
        # Layer-1 columns come FIRST so the slice feeding the next matmul is
        # lane-0 aligned (free view); the cls tail only feeds a store.
        fused = jnp.dot(hs, w1cls_ref[...],
                        preferred_element_type=jnp.float32) + b1cls_ref[...]
        h = jnp.maximum(fused[:, :hidden_dim], 0.0)                  # ReLU(layer1), f32
        logits_ref[...] = fused[:, hidden_dim:].astype(logits_ref.dtype)

        h = jnp.maximum(
            jnp.dot(h.astype(w2_ref.dtype), w2_ref[...],
                    preferred_element_type=jnp.float32) + b2_ref[...], 0.0)
        tmp = jnp.dot(h.astype(w3_ref.dtype), w3_ref[...],
                      preferred_element_type=jnp.float32) + b3_ref[...]   # (rows, 6)

        # inverse_sigmoid(reference); padded size columns hold 0.5 -> exactly 0,
        # matching PyTorch's `tmp[..., :3] += inverse_sigmoid(reference)`.
        r = jnp.clip(ref_ref[...], 0.0, 1.0)
        inv = jnp.log(jnp.maximum(r, EPS) / jnp.maximum(1.0 - r, EPS))
        boxes_ref[...] = jax.nn.sigmoid(tmp + inv).astype(boxes_ref.dtype)

        # ---------------- segmentation path (1x1x1 Conv3d) ------------------
        # out[b] = w_seg (Cout, Cin) @ x[b] (Cin, N) + b_seg  -> (Cout, N):
        # lane-dense output (N on the 128-lane axis) and already NCDHW order.
        wseg = wseg_ref[...]                                         # (Cout, Cin) bf16
        bseg = bseg_ref[...]                                         # (Cout, 1)   f32
        for b in range(batch):                                       # small static B
            seg = jnp.dot(wseg, xseg_ref[b],
                          preferred_element_type=jnp.float32) + bseg
            seg_ref[b] = seg.astype(seg_ref.dtype)

    return kernel


# ----------------------------- wrapper ----------------------------------------
def transoar_forward(hs, init_reference, inter_references, seg_src, prepared,
                     aux_loss=True, seg_proxy=True):
    """Mirrors TransoarNet.forward() from the decoder outputs onward.

    hs:               (L, B, Q, H)         decoder outputs
    init_reference:   (B, Q, 3)
    inter_references: (L-1, B, Q, 3)
    seg_src:          (B, Cin, D, H, W)    backbone 'P0' map, PyTorch NCDHW layout
    """
    L, B, Q, H = hs.shape
    rows = L * B * Q
    c1 = prepared["c1"]
    cout = prepared["w_seg"].shape[0]
    Bs, Cin, D, Hh, W = seg_src.shape
    N = D * Hh * W

    # References for every level; pad size columns with 0.5 (inverse_sigmoid=0).
    refs = jnp.concatenate([init_reference[None], inter_references], axis=0)  # (L,B,Q,3)
    ref_pad = jnp.concatenate(
        [refs, jnp.full((L, B, Q, 3), 0.5, refs.dtype)], axis=-1).reshape(rows, 6)

    # bf16 MXU operands (halved DMA bytes); accumulation stays f32 in-kernel.
    hs_flat = hs.reshape(rows, H).astype(jnp.bfloat16)
    xseg = seg_src.reshape(Bs, Cin, N).astype(jnp.bfloat16)   # natural NCDHW flatten

    vmem = pl.BlockSpec(memory_space=pltpu.MemorySpace.VMEM)

    logits, boxes, seg = pl.pallas_call(
        _make_fused_kernel(H, Bs),
        out_shape=(jax.ShapeDtypeStruct((rows, c1), jnp.float32),
                   jax.ShapeDtypeStruct((rows, 6), jnp.float32),
                   jax.ShapeDtypeStruct((Bs, cout, N), jnp.float32)),
        in_specs=[vmem] * 11,
        out_specs=(vmem, vmem, vmem),
    )(hs_flat, ref_pad,
      prepared["w1cls_t"], prepared["b1cls"],
      prepared["w2_t"], prepared["b2"],
      prepared["w3_t"], prepared["b3"],
      xseg, prepared["w_seg"], prepared["b_seg"])

    logits = logits.reshape(L, B, Q, c1)
    boxes = boxes.reshape(L, B, Q, 6)
    # Kernel output is already NCDHW-ordered: just a free reshape.
    pred_seg = seg.reshape(Bs, cout, D, Hh, W) if seg_proxy else 0

    out = {"pred_logits": logits[-1], "pred_boxes": boxes[-1], "pred_seg": pred_seg}
    if aux_loss:
        out["aux_outputs"] = [{"pred_logits": a, "pred_boxes": b}
                              for a, b in zip(logits[:-1], boxes[:-1])]
    return out


# ----------------------------- deterministic parameters -----------------------
def init_params(key):
    """Parameters in PyTorch layout: Linear/Conv weights are (out, in)."""
    H = HIDDEN_DIM
    C1 = NUM_CLASSES + 1
    CIN, COUT = START_CHANNELS, NUM_ORGANS + 1
    ks = jax.random.split(key, 4)
    scale = 0.02
    return {
        "w_cls": scale * jax.random.normal(ks[0], (C1, H), jnp.float32),
        "b_cls": jnp.zeros((C1,), jnp.float32),
        "w1": scale * jax.random.normal(ks[1], (H, H), jnp.float32),
        "b1": jnp.zeros((H,), jnp.float32),
        "w2": scale * jax.random.normal(ks[2], (H, H), jnp.float32),
        "b2": jnp.zeros((H,), jnp.float32),
        # _reset_parameter(): last bbox layer weight = 0, bias = 0, bias[2:] = -2
        "w3": jnp.zeros((6, H), jnp.float32),
        "b3": jnp.array([0.0, 0.0, -2.0, -2.0, -2.0, -2.0], jnp.float32),
        "w_seg": scale * jax.random.normal(ks[3], (COUT, CIN), jnp.float32),
        "b_seg": jnp.zeros((COUT,), jnp.float32),
    }


def prepare_params(p):
    """Host-side, one-time: transpose to (in, out), fuse bbox layer-1 + cls
    (layer-1 columns FIRST so the MXU-feeding slice is lane-0 aligned), and
    cast weights to bf16 for the MXU.  Biases stay f32."""
    c1 = p["w_cls"].shape[0]
    bf16 = lambda a: a.astype(jnp.bfloat16)
    return {
        "c1": int(c1),
        "w1cls_t": bf16(jnp.concatenate([p["w1"].T, p["w_cls"].T], axis=1)),  # (H, H+C1)
        "b1cls": jnp.concatenate([p["b1"], p["b_cls"]])[None, :],              # (1, H+C1)
        "w2_t": bf16(p["w2"].T), "b2": p["b2"][None, :],
        "w3_t": bf16(p["w3"].T), "b3": p["b3"][None, :],
        "w_seg": bf16(p["w_seg"]),          # (Cout, Cin) PyTorch layout, used as LHS
        "b_seg": p["b_seg"][:, None],       # (Cout, 1)
    }


# ----------------------------- main -------------------------------------------
if __name__ == "__main__":
    key = jax.random.PRNGKey(0)
    k_hs, k_ir, k_inter, k_seg, k_par = jax.random.split(key, 5)

    L, B, Q, Hd = NUM_DEC_LAYERS, BATCH, NUM_QUERIES, HIDDEN_DIM
    hs = jax.random.normal(k_hs, (L, B, Q, Hd), jnp.float32)
    init_reference = jax.random.uniform(k_ir, (B, Q, 3), jnp.float32)
    inter_references = jax.random.uniform(k_inter, (L - 1, B, Q, 3), jnp.float32)
    # Backbone 'P0' feature map in PyTorch's native NCDHW layout.
    seg_src = jax.random.normal(
        k_seg, (B, START_CHANNELS) + SEG_SPATIAL, jnp.float32)

    params = init_params(k_par)
    prepared = prepare_params(params)   # transposed / fused / bf16-cast once, host-side

    out = transoar_forward(hs, init_reference, inter_references, seg_src, prepared)
    jax.block_until_ready(out["pred_logits"])
    jax.block_until_ready(out["pred_boxes"])
    jax.block_until_ready(out["pred_seg"])
    for aux in out["aux_outputs"]:
        jax.block_until_ready(aux["pred_logits"])
        jax.block_until_ready(aux["pred_boxes"])

    assert out["pred_logits"].shape == (B, Q, NUM_CLASSES + 1)
    assert out["pred_boxes"].shape == (B, Q, 6)
    assert out["pred_seg"].shape == (B, NUM_ORGANS + 1) + SEG_SPATIAL
    assert len(out["aux_outputs"]) == L - 1
    print("KERNEL_OK")
</pallas_src>

<mosaic_0001>
module attributes {stable_mosaic.version = 11 : i64} {
  func.func @kernel(%arg0: memref<32x32xbf16, #tpu.memory_space<vmem>>, %arg1: memref<32x6xf32, #tpu.memory_space<vmem>>, %arg2: memref<32x37xbf16, #tpu.memory_space<vmem>>, %arg3: memref<1x37xf32, #tpu.memory_space<vmem>>, %arg4: memref<32x32xbf16, #tpu.memory_space<vmem>>, %arg5: memref<1x32xf32, #tpu.memory_space<vmem>>, %arg6: memref<32x6xbf16, #tpu.memory_space<vmem>>, %arg7: memref<1x6xf32, #tpu.memory_space<vmem>>, %arg8: memref<2x8x128xbf16, #tpu.memory_space<vmem>>, %arg9: memref<5x8xbf16, #tpu.memory_space<vmem>>, %arg10: memref<5x1xf32, #tpu.memory_space<vmem>>, %arg11: memref<32x5xf32, #tpu.memory_space<vmem>>, %arg12: memref<32x6xf32, #tpu.memory_space<vmem>>, %arg13: memref<2x5x128xf32, #tpu.memory_space<vmem>>) attributes {dimension_semantics = [], scalar_prefetch = 0 : i64, scratch_operands = 0 : i64, tpu.core_type = #tpu.core_type<tc>} {
    %c0 = arith.constant 0 : index
    %c0_0 = arith.constant 0 : index
    %0 = vector.load %arg0[%c0, %c0_0] : memref<32x32xbf16, #tpu.memory_space<vmem>>, vector<32x32xbf16>
    %c0_1 = arith.constant 0 : index
    %c0_2 = arith.constant 0 : index
    %1 = vector.load %arg2[%c0_1, %c0_2] : memref<32x37xbf16, #tpu.memory_space<vmem>>, vector<32x37xbf16>
    %cst = arith.constant dense<0.000000e+00> : vector<32x37xf32>
    %2 = tpu.matmul %0, %1, %cst {dimension_numbers = #tpu.dot_dimension_numbers<[1], [0], [0], [1], [0, 0, 1, 1], [], []>} : vector<32x32xbf16>, vector<32x37xbf16>, vector<32x37xf32> -> vector<32x37xf32>
    %c0_3 = arith.constant 0 : index
    %c0_4 = arith.constant 0 : index
    %3 = vector.load %arg3[%c0_3, %c0_4] : memref<1x37xf32, #tpu.memory_space<vmem>>, vector<1x37xf32>
    %4 = vector.broadcast %3 : vector<1x37xf32> to vector<32x37xf32>
    %5 = arith.addf %2, %4 : vector<32x37xf32>
    %6 = vector.extract_strided_slice %5 {offsets = [0, 0], sizes = [32, 32], strides = [1, 1]} : vector<32x37xf32> to vector<32x32xf32>
    %cst_5 = arith.constant 0.000000e+00 : f32
    %7 = vector.broadcast %cst_5 : f32 to vector<32x32xf32>
    %8 = arith.maximumf %6, %7 : vector<32x32xf32>
    %9 = vector.extract_strided_slice %5 {offsets = [0, 32], sizes = [32, 5], strides = [1, 1]} : vector<32x37xf32> to vector<32x5xf32>
    %c0_6 = arith.constant 0 : index
    %c0_7 = arith.constant 0 : index
    %10 = vector.load %arg11[%c0_6, %c0_7] : memref<32x5xf32, #tpu.memory_space<vmem>>, vector<32x5xf32>
    tpu.vector_store %arg11[%c0_6, %c0_7], %9 {strides = array<i32>} : memref<32x5xf32, #tpu.memory_space<vmem>>, vector<32x5xf32>,
    %11 = arith.truncf %8 : vector<32x32xf32> to vector<32x32xbf16>
    %c0_8 = arith.constant 0 : index
    %c0_9 = arith.constant 0 : index
    %12 = vector.load %arg4[%c0_8, %c0_9] : memref<32x32xbf16, #tpu.memory_space<vmem>>, vector<32x32xbf16>
    %cst_10 = arith.constant dense<0.000000e+00> : vector<32x32xf32>
    %13 = tpu.matmul %11, %12, %cst_10 {dimension_numbers = #tpu.dot_dimension_numbers<[1], [0], [0], [1], [0, 0, 1, 1], [], []>} : vector<32x32xbf16>, vector<32x32xbf16>, vector<32x32xf32> -> vector<32x32xf32>
    %c0_11 = arith.constant 0 : index
    %c0_12 = arith.constant 0 : index
    %14 = vector.load %arg5[%c0_11, %c0_12] : memref<1x32xf32, #tpu.memory_space<vmem>>, vector<1x32xf32>
    %15 = vector.broadcast %14 : vector<1x32xf32> to vector<32x32xf32>
    %16 = arith.addf %13, %15 : vector<32x32xf32>
    %cst_13 = arith.constant 0.000000e+00 : f32
    %17 = vector.broadcast %cst_13 : f32 to vector<32x32xf32>
    %18 = arith.maximumf %16, %17 : vector<32x32xf32>
    %19 = arith.truncf %18 : vector<32x32xf32> to vector<32x32xbf16>
    %c0_14 = arith.constant 0 : index
    %c0_15 = arith.constant 0 : index
    %20 = vector.load %arg6[%c0_14, %c0_15] : memref<32x6xbf16, #tpu.memory_space<vmem>>, vector<32x6xbf16>
    %cst_16 = arith.constant dense<0.000000e+00> : vector<32x6xf32>
    %21 = tpu.matmul %19, %20, %cst_16 {dimension_numbers = #tpu.dot_dimension_numbers<[1], [0], [0], [1], [0, 0, 1, 1], [], []>} : vector<32x32xbf16>, vector<32x6xbf16>, vector<32x6xf32> -> vector<32x6xf32>
    %c0_17 = arith.constant 0 : index
    %c0_18 = arith.constant 0 : index
    %22 = vector.load %arg7[%c0_17, %c0_18] : memref<1x6xf32, #tpu.memory_space<vmem>>, vector<1x6xf32>
    %23 = vector.broadcast %22 : vector<1x6xf32> to vector<32x6xf32>
    %24 = arith.addf %21, %23 : vector<32x6xf32>
    %c0_19 = arith.constant 0 : index
    %c0_20 = arith.constant 0 : index
    %25 = vector.load %arg1[%c0_19, %c0_20] : memref<32x6xf32, #tpu.memory_space<vmem>>, vector<32x6xf32>
    %cst_21 = arith.constant 0.000000e+00 : f32
    %cst_22 = arith.constant 1.000000e+00 : f32
    %26 = vector.broadcast %cst_21 : f32 to vector<32x6xf32>
    %27 = arith.maximumf %26, %25 : vector<32x6xf32>
    %28 = vector.broadcast %cst_22 : f32 to vector<32x6xf32>
    %29 = arith.minimumf %28, %27 : vector<32x6xf32>
    %cst_23 = arith.constant 9.99999974E-6 : f32
    %30 = vector.broadcast %cst_23 : f32 to vector<32x6xf32>
    %31 = arith.maximumf %29, %30 : vector<32x6xf32>
    %cst_24 = arith.constant 1.000000e+00 : f32
    %32 = vector.broadcast %cst_24 : f32 to vector<32x6xf32>
    %33 = arith.subf %32, %29 : vector<32x6xf32>
    %cst_25 = arith.constant 9.99999974E-6 : f32
    %34 = vector.broadcast %cst_25 : f32 to vector<32x6xf32>
    %35 = arith.maximumf %33, %34 : vector<32x6xf32>
    %36 = arith.divf %31, %35 : vector<32x6xf32>
    %37 = math.log %36 : vector<32x6xf32>
    %38 = arith.addf %24, %37 : vector<32x6xf32>
    %39 = arith.negf %38 : vector<32x6xf32>
    %40 = math.exp %39 : vector<32x6xf32>
    %cst_26 = arith.constant 1.000000e+00 : f32
    %41 = vector.broadcast %cst_26 : f32 to vector<32x6xf32>
    %42 = arith.addf %41, %40 : vector<32x6xf32>
    %43 = arith.divf %41, %42 : vector<32x6xf32>
    %c0_27 = arith.constant 0 : index
    %c0_28 = arith.constant 0 : index
    %44 = vector.load %arg12[%c0_27, %c0_28] : memref<32x6xf32, #tpu.memory_space<vmem>>, vector<32x6xf32>
    tpu.vector_store %arg12[%c0_27, %c0_28], %43 {strides = array<i32>} : memref<32x6xf32, #tpu.memory_space<vmem>>, vector<32x6xf32>,
    %c0_29 = arith.constant 0 : index
    %c0_30 = arith.constant 0 : index
    %45 = vector.load %arg9[%c0_29, %c0_30] : memref<5x8xbf16, #tpu.memory_space<vmem>>, vector<5x8xbf16>
    %c0_31 = arith.constant 0 : index
    %c0_32 = arith.constant 0 : index
    %46 = vector.load %arg10[%c0_31, %c0_32] : memref<5x1xf32, #tpu.memory_space<vmem>>, vector<5x1xf32>
    %c0_33 = arith.constant 0 : index
    %c0_34 = arith.constant 0 : index
    %c0_35 = arith.constant 0 : index
    %47 = vector.load %arg8[%c0_33, %c0_34, %c0_35] : memref<2x8x128xbf16, #tpu.memory_space<vmem>>, vector<1x8x128xbf16>
    %48 = vector.shape_cast %47 : vector<1x8x128xbf16> to vector<8x128xbf16>
    %cst_36 = arith.constant dense<0.000000e+00> : vector<5x128xf32>
    %49 = tpu.matmul %45, %48, %cst_36 {dimension_numbers = #tpu.dot_dimension_numbers<[1], [0], [0], [1], [0, 0, 1, 1], [], []>} : vector<5x8xbf16>, vector<8x128xbf16>, vector<5x128xf32> -> vector<5x128xf32>
    %50 = vector.broadcast %46 : vector<5x1xf32> to vector<5x128xf32>
    %51 = arith.addf %49, %50 : vector<5x128xf32>
    %c0_37 = arith.constant 0 : index
    %c0_38 = arith.constant 0 : index
    %c0_39 = arith.constant 0 : index
    %52 = vector.load %arg13[%c0_37, %c0_38, %c0_39] : memref<2x5x128xf32, #tpu.memory_space<vmem>>, vector<1x5x128xf32>
    %53 = vector.shape_cast %52 : vector<1x5x128xf32> to vector<5x128xf32>
    %54 = vector.shape_cast %51 : vector<5x128xf32> to vector<1x5x128xf32>
    tpu.vector_store %arg13[%c0_37, %c0_38, %c0_39], %54 {strides = array<i32>} : memref<2x5x128xf32, #tpu.memory_space<vmem>>, vector<1x5x128xf32>,
    %c1 = arith.constant 1 : index
    %c0_40 = arith.constant 0 : index
    %c0_41 = arith.constant 0 : index
    %55 = vector.load %arg8[%c1, %c0_40, %c0_41] : memref<2x8x128xbf16, #tpu.memory_space<vmem>>, vector<1x8x128xbf16>
    %56 = vector.shape_cast %55 : vector<1x8x128xbf16> to vector<8x128xbf16>
    %cst_42 = arith.constant dense<0.000000e+00> : vector<5x128xf32>
    %57 = tpu.matmul %45, %56, %cst_42 {dimension_numbers = #tpu.dot_dimension_numbers<[1], [0], [0], [1], [0, 0, 1, 1], [], []>} : vector<5x8xbf16>, vector<8x128xbf16>, vector<5x128xf32> -> vector<5x128xf32>
    %58 = vector.broadcast %46 : vector<5x1xf32> to vector<5x128xf32>
    %59 = arith.addf %57, %58 : vector<5x128xf32>
    %c1_43 = arith.constant 1 : index
    %c0_44 = arith.constant 0 : index
    %c0_45 = arith.constant 0 : index
    %60 = vector.load %arg13[%c1_43, %c0_44, %c0_45] : memref<2x5x128xf32, #tpu.memory_space<vmem>>, vector<1x5x128xf32>
    %61 = vector.shape_cast %60 : vector<1x5x128xf32> to vector<5x128xf32>
    %62 = vector.shape_cast %59 : vector<5x128xf32> to vector<1x5x128xf32>
    tpu.vector_store %arg13[%c1_43, %c0_44, %c0_45], %62 {strides = array<i32>} : memref<2x5x128xf32, #tpu.memory_space<vmem>>, vector<1x5x128xf32>,
    return
  }
}

</mosaic_0001>

<bundles_post_ra>
// kernel: tpu_custom_call.1
= control target key start
LH: loop header
LB: loop body
LE: loop exit
PB: predicated region body
PF: predicated region fallthrough
CT: control target
= control target key end

     0   :  { %19 = vsyncpa [#allocation3], 0  ;;  %s598_s28 = smov [#allocation2]   ;;  %s797_s0 = inlined_call_operand.vmem [shape: bf16[32,32], index: 0, kind: input, shape index: {}]   ;;  %s798_s1 = inlined_call_operand.vmem [shape: f32[32,6], index: 1, kind: input, shape index: {}]   ;;  %s799_s2 = inlined_call_operand.vmem [shape: bf16[32,37], index: 2, kind: input, shape index: {}]   ;;  %s800_s3 = inlined_call_operand.vmem [shape: f32[1,37], index: 3, kind: input, shape index: {}]   ;;  %s801_s4 = inlined_call_operand.vmem [shape: bf16[32,32], index: 4, kind: input, shape index: {}]   ;;  %s802_s5 = inlined_call_operand.hbm [shape: f32[1,32], index: 5, kind: input, shape index: {}]   ;;  %s803_s6 = inlined_call_operand.vmem [shape: bf16[32,6], index: 6, kind: input, shape index: {}]   ;;  %s804_s7 = inlined_call_operand.vmem [shape: f32[1,6], index: 7, kind: input, shape index: {}]   ;;  %s805_s8 = inlined_call_operand.vmem [shape: bf16[2,8,128], index: 8, kind: input, shape index: {}]   ;;  %s806_s9 = inlined_call_operand.vmem [shape: bf16[5,8], index: 9, kind: input, shape index: {}]   ;;  %s807_s10 = inlined_call_operand.vmem [shape: f32[5,1], index: 10, kind: input, shape index: {}]   ;;  %s808_s11 = inlined_call_operand.vmem [shape: f32[32,5], index: 11, kind: output, shape index: {0}]   ;;  %s809_s12 = inlined_call_operand.vmem [shape: f32[32,6], index: 12, kind: output, shape index: {1}]   ;;  %s810_s13 = inlined_call_operand.vmem [shape: f32[2,5,128], index: 13, kind: output, shape index: {2}]  }
   0x1   :  { %s35_s27 = sshll.u32 %s802_s5, 4  ;;  %s37_s29 = sshll.u32 %s598_s28, 4  ;;  %s36_s27 = int_to_ptr.hbm [resolvable:$true] %s35_s27  ;;  %s38_s29 = int_to_ptr.vmem [resolvable:$true] %s37_s29 }
   0x2   :  { %40 = dma.hbm_to_vmem [thread:$0]  %s36_s27, 16, %s38_s29, [#allocation3]  }
   0x3   :  { %596 = dma.done.wait [#allocation3], 16  }
   0x4   :  { %597 = vsyncadd [#allocation3], 4294967280  ;;  %v599_v0 = vmov 0   ;;  %v528_v1 = vld [vmem:[%s799_s2 + $0x8] sm:$0xff]  ;;  %v417_v2 = vld [vmem:[%s807_s10] sm:$0x1f] }
   0x5   :  { %536 = vset.pattern.permute.xlu0 %v599_v0  ;;  %103 = vmatpush.bf16.msra.mxu0 %v528_v1  ;;  %v527_v3 = vld [vmem:[%s799_s2] sm:$0xff]  ;;  %vm90_vm0 = vcmask 261120   ;;  %v526_v5 = vld [vmem:[%s797_s0 + $0x8] sm:$0xff]  ;;  %s600_s26 = smov 96   ;;  %vm136_vm1 = vcmask 39936   ;;  %vm428_vm2 = vcmask 1043456  }
   0x6   :  { %421 = vperm.xlu0 %536, %v417_v2   ;;  %v525_v4 = vld [vmem:[%s797_s0] sm:$0xff]  ;;  %v530_v6 = vld [vmem:[%s801_s4 + $0x8] sm:$0xff]  ;;  %vm424_vm3 = vcmask 64512   ;;  %v241_v58 = vld [vmem:[%s798_s1 + $0x10] sm:$0xff] }
   0x7   :  { %175 = vmatpush.bf16.msra.mxu1 %v530_v6  ;;  %v529_v7 = vld [vmem:[%s801_s4] sm:$0xff]  ;;  %v532_v24 = vld [vmem:[%s803_s6 + $0x8] sm:$0xff]  ;;  %v245_v60 = vmax.f32 %v241_v58, 0.0  ;;  %v242_v63 = vld [vmem:[%s798_s1 + $0x18] sm:$0xff] }
   0x8   :  { %v537_v8 = vld [vmem:[%s800_s3] ss:$0 sm:$0xff]  ;;  %226 = vmatpush.bf16.msra.mxu2 %v532_v24  ;;  %v522_v33 = vld [vmem:[%s805_s8 + $0x4] sm:$0xf]  ;;  %v240_v53 = vld [vmem:[%s798_s1 + $0x8] sm:$0xff]  ;;  %v246_v2 = vmax.f32 %v242_v63, 0.0 }
   0x9   :  { %104 = vmatpush.bf16.msra.mxu0 %v527_v3  ;;  %v531_v27 = vld [vmem:[%s803_s6] sm:$0xff]  ;;  %v449_v35 = vsel %vm428_vm2, %v522_v33, 0  ;;  %v244_v55 = vmax.f32 %v240_v53, 0.0  ;;  %v745_v62 = vmin.f32 %v245_v60, 1.0 }
   0xa   :  { %v418_v30 = vld [vmem:[%s805_s8] sm:$0xf] }
   0xb   :  { %176 = vmatpush.bf16.msra.mxu1 %v529_v7  ;;  %v430_v32 = vsel %vm428_vm2, %v418_v30, 0  ;;  %v416_v34 = vld [vmem:[%s806_s9] sm:$0x7]  ;;  %v739_v57 = vmin.f32 %v244_v55, 1.0  ;;  %v257_v1 = vsub.f32 1.0, %v745_v62 }
   0xc   :  { %495 = vmatmul.msk.bf16.vlgmr.msra.gmra.mxu0 %vm90_vm0, %v525_v4  ;;  %227 = vmatpush.bf16.msra.mxu2 %v531_v27  ;;  %v538_v36 = vld [vmem:[#allocation2] ss:$0 sm:$0xff] }
   0xd   :  { %439 = vmatpush.bf16.msra.mxu3 %v430_v32  ;;  %v239_v50 = vld [vmem:[%s798_s1] sm:$0xff]  ;;  %v256_v59 = vsub.f32 1.0, %v739_v57  ;;  %v261_v4 = vmax.f32 %v257_v1, 1e-05 }
   0xe   :  { %v243_v51 = vmax.f32 %v239_v50, 0.0 }
   0xf   :  { %v260_v61 = vmax.f32 %v256_v59, 1e-05  ;;  %vm298_vm12 = vweird.f32 %v261_v4 }
  0x10   :  { %521 = vmatmul.msk.bf16.vlgmr.msra.gmra.mxu3 %vm424_vm3, %v416_v34  ;;  %v247_v52 = vmin.f32 %v243_v51, 1.0 }
  0x11   :  { %458 = vmatpush.bf16.msrb.mxu3 %v449_v35  ;;  %vm283_vm8 = vweird.f32 %v260_v61  ;;  %v289_v24 = vand.u32 2147483648, %v260_v61 }
  0x12   :  { %v255_v54 = vsub.f32 1.0, %v247_v52 }
  0x13   :  { %v290_v30 = vor.u32 1.1754944e-38, %v289_v24 }
  0x14   :  { %v259_v56 = vmax.f32 %v255_v54, 1e-05 }
  0x16   :  { %540 = vrcp.f32 %v259_v56  ;;  %vm268_vm4 = vweird.f32 %v259_v56 }
  0x17   :  { %542 = vrcp.f32 %v260_v61 }
  0x18   :  { %544 = vrcp.f32 %v261_v4 }
  0x1c   :  { %496 = vmatmul.msk.bf16.gmra.mxu0 %vm90_vm0, %v526_v5  ;;  %v541_v0 = vpop.eup %540  ;;  %v751_v5 = vmin.f32 %v246_v2, 1.0 }
  0x1d   :  { %v264_v3 = vmul.f32 %v541_v0, %v259_v56  ;;  %v543_v7 = vpop.eup %542  ;;  %vm269_vm5 = vweird.f32 %v541_v0 }
  0x1e   :  { %vm270_vm6 = vmor %vm268_vm4, %vm269_vm5  ;;  %vm284_vm9 = vweird.f32 %v543_v7 }
  0x1f   :  { %v265_v6 = vsub.f32 1.0, %v264_v3  ;;  %vm285_vm10 = vmor %vm283_vm8, %vm284_vm9 }
  0x20   :  { %523 = vmatmul.msk.bf16.vlgmr.msrb.gmra.mxu3 %vm424_vm3, %v416_v34  ;;  %v252_v34 = vmax.f32 %v739_v57, 1e-05 }
  0x78   :  { %v702_v23 = vpop.permute.xlu0 %421 }
  0x89   :  { %v106_v9 = vpop.f32.mrf.mxu0 }
  0x8a   :  { %v107_v10 = vadd.f32 %v537_v8, %v106_v9  ;;  %v266_v9 = vmul.f32 %v541_v0, %v265_v6 }
  0x8c   :  { %124 = vrot.lane.b32.xlu0 %v107_v10, %s600_s26  ;;  %v116_v13 = vmax.f32 %v107_v10, 0.0  ;;  %v279_v10 = vmul.f32 %v543_v7, %v260_v61 }
  0x91   :  { %v108_v11 = vpop.f32.mrf.mxu0 }
  0x92   :  { %v109_v12 = vadd.f32 %v537_v8, %v108_v11  ;;  %v274_v11 = vand.u32 2147483648, %v259_v56 }
  0x94   :  { %v117_v14 = vmax.f32 %v109_v12, 0.0  ;;  %126 = vrot.lane.b32.xlu1 %v109_v12, %s600_s26 }
  0x96   :  { %v141_v15 = vpack.c.bf16 %v117_v14, %v116_v13  ;;  %v267_v13 = vadd.f32 %v541_v0, %v266_v9  ;;  %v272_v14 = vand.u32 2147483647, %v259_v56 }
  0x98   :  { %505 = vmatmul.msk.bf16.vlgmr.msra.gmra.mxu1 %vm90_vm0, %v141_v15  ;;  %v280_v15 = vsub.f32 1.0, %v279_v10  ;;  %vm273_vm7 = vcmp.eq.f32.partialorder %v272_v14, 8.507059e+37 }
  0x99   :  { %v111_v16 = vpop.f32.mrf.mxu0 }
  0x9a   :  { %v112_v17 = vadd.f32 %v537_v8, %v111_v16  ;;  %v545_v16 = vpop.eup %544 }
  0x9b   :  { %vm299_vm13 = vweird.f32 %v545_v16 }
  0x9c   :  { %128 = vrot.lane.b32.xlu1 %v112_v17, %s600_s26  ;;  %v118_v20 = vmax.f32 %v112_v17, 0.0  ;;  %v275_v17 = vor.u32 1.1754944e-38, %v274_v11  ;;  %vm300_vm14 = vmor %vm298_vm12, %vm299_vm13 }
  0xa1   :  { %v113_v18 = vpop.f32.mrf.mxu0 }
  0xa2   :  { %v114_v19 = vadd.f32 %v537_v8, %v113_v18  ;;  %v258_v8 = vsub.f32 1.0, %v751_v5  ;;  %v271_v18 = vsel %vm270_vm6, %v541_v0, %v267_v13  ;;  %v254_v0 = vmax.f32 %v751_v5, 1e-05 }
  0xa4   :  { %v119_v21 = vmax.f32 %v114_v19, 0.0  ;;  %130 = vrot.lane.b32.xlu2 %v114_v19, %s600_s26  ;;  %v754_v12 = vmax.f32 %v258_v8, 1e-05  ;;  %v281_v19 = vmul.f32 %v543_v7, %v280_v15 }
  0xa6   :  { %v142_v22 = vpack.c.bf16 %v119_v21, %v118_v20  ;;  %546 = vrcp.f32 %v754_v12  ;;  %v294_v20 = vmul.f32 %v545_v16, %v261_v4  ;;  %v251_v21 = vmax.f32 %v247_v52, 1e-05 }
  0xa7   :  { %v319_v50 = vand.u32 2147483648, %v754_v12  ;;  %v317_v53 = vand.u32 2147483647, %v754_v12 }
  0xa8   :  { %506 = vmatmul.msk.bf16.gmra.mxu1 %vm90_vm0, %v142_v22  ;;  %v276_v22 = vsel %vm273_vm7, %v275_v17, %v271_v18  ;;  %v295_v27 = vsub.f32 1.0, %v294_v20  ;;  %vm411_vm7 = vcmask 48128  }
  0xa9   :  { %v320_v59 = vor.u32 1.1754944e-38, %v319_v50  ;;  %vm318_vm3 = vcmp.eq.f32.partialorder %v317_v53, 8.507059e+37 }
  0xaa   :  { %v296_v32 = vmul.f32 %v545_v16, %v295_v27 }
  0xfe   :  { %v131_v25 = vpop.permute.xlu2 %130  ;;  %v125_v26 = vpop.permute.xlu0 %124 }
  0xff   :  { %140 = vst.msk [vmem:[%s808_s11 + $0x18] sm:$0xff] %vm136_vm1, %v131_v25  ;;  %v282_v25 = vadd.f32 %v543_v7, %v281_v19 }
 0x100   :  { %137 = vst.msk [vmem:[%s808_s11] sm:$0xff] %vm136_vm1, %v125_v26  ;;  %v287_v26 = vand.u32 2147483647, %v260_v61 }
 0x102   :  { %vm288_vm11 = vcmp.eq.f32.partialorder %v287_v26, 8.507059e+37 }
 0x106   :  { %v127_v28 = vpop.permute.xlu1 %126 }
 0x107   :  { %138 = vst.msk [vmem:[%s808_s11 + $0x8] sm:$0xff] %vm136_vm1, %v127_v28  ;;  %v547_v28 = vpop.eup %546 }
 0x108   :  { %v309_v33 = vmul.f32 %v547_v28, %v754_v12 }
 0x10e   :  { %v129_v29 = vpop.permute.xlu1 %128 }
 0x10f   :  { %139 = vst.msk [vmem:[%s808_s11 + $0x10] sm:$0xff] %vm136_vm1, %v129_v29  ;;  %v277_v29 = vmul.f32 %v276_v22, %v251_v21  ;;  %vm314_vm1 = vweird.f32 %v547_v28 }
 0x111   :  { %548 = vlog2.f32 %v277_v29 }
 0x115   :  { %v178_v31 = vpop.f32.mrf.mxu1 }
 0x116   :  { %v179_v37 = vadd.f32 %v538_v36, %v178_v31  ;;  %v286_v31 = vsel %vm285_vm10, %v543_v7, %v282_v25 }
 0x117   :  { %v291_v35 = vsel %vm288_vm11, %v290_v30, %v286_v31 }
 0x118   :  { %v188_v40 = vmax.f32 %v179_v37, 0.0  ;;  %v297_v37 = vadd.f32 %v545_v16, %v296_v32 }
 0x11d   :  { %v180_v38 = vpop.f32.mrf.mxu1 }
 0x11e   :  { %v181_v39 = vadd.f32 %v538_v36, %v180_v38  ;;  %v302_v38 = vand.u32 2147483647, %v261_v4 }
 0x120   :  { %v189_v41 = vmax.f32 %v181_v39, 0.0  ;;  %v310_v39 = vsub.f32 1.0, %v309_v33  ;;  %vm303_vm15 = vcmp.eq.f32.partialorder %v302_v38, 8.507059e+37 }
 0x122   :  { %v192_v42 = vpack.c.bf16 %v189_v41, %v188_v40  ;;  %v292_v40 = vmul.f32 %v291_v35, %v252_v34  ;;  %v441_v41 = vpop.f32.mrf.mxu3 }
 0x123   :  { %v442_v60 = vadd.f32 %v441_v41, %v702_v23 }
 0x124   :  { %515 = vmatmul.msk.bf16.vlgmr.msra.gmra.mxu2 %vm90_vm0, %v192_v42  ;;  %550 = vlog2.f32 %v292_v40 }
 0x125   :  { %v183_v43 = vpop.f32.mrf.mxu1  ;;  %445 = vst [vmem:[%s810_s13] sm:$0x1f] %v442_v60 }
 0x126   :  { %v184_v44 = vadd.f32 %v538_v36, %v183_v43  ;;  %v549_v43 = vpop.eup %548 }
 0x128   :  { %v190_v47 = vmax.f32 %v184_v44, 0.0  ;;  %v301_v44 = vsel %vm300_vm14, %v545_v16, %v297_v37 }
 0x12a   :  { %v443_v57 = vpop.f32.mrf.mxu3  ;;  %v551_v61 = vpop.eup %550 }
 0x12b   :  { %v326_v1 = vmul.f32 0.6931472, %v551_v61 }
 0x12d   :  { %v185_v45 = vpop.f32.mrf.mxu1 }
 0x12e   :  { %v186_v46 = vadd.f32 %v538_v36, %v185_v45  ;;  %v304_v36 = vand.u32 2147483648, %v261_v4  ;;  %v311_v45 = vmul.f32 %v547_v28, %v310_v39 }
 0x130   :  { %v191_v48 = vmax.f32 %v186_v46, 0.0  ;;  %v305_v42 = vor.u32 1.1754944e-38, %v304_v36  ;;  %v539_v46 = vld [vmem:[%s804_s7] ss:$0 sm:$0xff]  ;;  %v312_v52 = vadd.f32 %v547_v28, %v311_v45 }
 0x132   :  { %v193_v49 = vpack.c.bf16 %v191_v48, %v190_v47  ;;  %v253_v47 = vmax.f32 %v745_v62, 1e-05  ;;  %v324_v48 = vmul.f32 0.6931472, %v549_v43  ;;  %v460_v7 = vpop.f32.mrf.mxu3 }
 0x133   :  { %v461_v5 = vadd.f32 %v460_v7, %v702_v23 }
 0x134   :  { %516 = vmatmul.msk.bf16.gmra.mxu2 %vm90_vm0, %v193_v49  ;;  %vm313_vm0 = vweird.f32 %v754_v12  ;;  %v306_v49 = vsel %vm303_vm15, %v305_v42, %v301_v44 }
 0x135   :  { %vm766_vm2 = vmor %vm313_vm0, %vm314_vm1  ;;  %v307_v56 = vmul.f32 %v306_v49, %v253_v47  ;;  %524 = vst [vmem:[%s810_s13 + $0x8] sm:$0x1f] %v461_v5 }
 0x136   :  { %v316_v62 = vsel %vm766_vm2, %v547_v28, %v312_v52 }
 0x137   :  { %552 = vlog2.f32 %v307_v56  ;;  %v321_v2 = vsel %vm318_vm3, %v320_v59, %v316_v62 }
 0x138   :  { %v322_v6 = vmul.f32 %v321_v2, %v254_v0 }
 0x13a   :  { %v462_v16 = vpop.f32.mrf.mxu3 }
 0x13d   :  { %v553_v9 = vpop.eup %552 }
 0x13e   :  { %v328_v13 = vmul.f32 0.6931472, %v553_v9 }
 0x1a7   :  { %v229_v51 = vpop.f32.mrf.mxu2 }
 0x1a8   :  { %v230_v54 = vadd.f32 %v539_v46, %v229_v51 }
 0x1aa   :  { %v331_v58 = vadd.f32 %v324_v48, %v230_v54 }
 0x1ac   :  { %v517_v63 = vmul.f32 -1.442695, %v331_v58 }
 0x1ae   :  { %554 = vpow2.f32 %v517_v63 }
 0x1af   :  { %v231_v3 = vpop.f32.mrf.mxu2  ;;  %556 = vlog2.f32 %v322_v6 }
 0x1b0   :  { %v232_v4 = vadd.f32 %v539_v46, %v231_v3 }
 0x1b2   :  { %v332_v8 = vadd.f32 %v326_v1, %v232_v4 }
 0x1b4   :  { %v555_v10 = vpop.eup %554  ;;  %v518_v11 = vmul.f32 -1.442695, %v332_v8 }
 0x1b5   :  { %v347_v12 = vadd.f32 1.0, %v555_v10  ;;  %v557_v18 = vpop.eup %556 }
 0x1b6   :  { %558 = vpow2.f32 %v518_v11  ;;  %v330_v25 = vmul.f32 0.6931472, %v557_v18 }
 0x1b7   :  { %560 = vrcp.f32 %v347_v12  ;;  %v234_v14 = vpop.f32.mrf.mxu2  ;;  %v362_v29 = vand.u32 2147483648, %v347_v12  ;;  %v360_v30 = vand.u32 2147483647, %v347_v12  ;;  %vm356_vm5 = vweird.f32 %v347_v12 }
 0x1b8   :  { %v235_v15 = vadd.f32 %v539_v46, %v234_v14 }
 0x1b9   :  { %v363_v36 = vor.u32 1.1754944e-38, %v362_v29  ;;  %vm361_vm8 = vcmp.eq.f32.partialorder %v360_v30, 8.507059e+37 }
 0x1ba   :  { %v333_v17 = vadd.f32 %v328_v13, %v235_v15 }
 0x1bc   :  { %v559_v19 = vpop.eup %558  ;;  %v519_v20 = vmul.f32 -1.442695, %v333_v17 }
 0x1bd   :  { %v561_v21 = vpop.eup %560  ;;  %v348_v22 = vadd.f32 1.0, %v559_v19 }
 0x1be   :  { %v352_v24 = vmul.f32 %v561_v21, %v347_v12  ;;  %562 = vpow2.f32 %v519_v20  ;;  %vm357_vm4 = vweird.f32 %v561_v21 }
 0x1bf   :  { %564 = vrcp.f32 %v348_v22  ;;  %v236_v26 = vpop.f32.mrf.mxu2  ;;  %vm358_vm6 = vmor %vm356_vm5, %vm357_vm4  ;;  %v377_v42 = vand.u32 2147483648, %v348_v22  ;;  %v375_v44 = vand.u32 2147483647, %v348_v22  ;;  %vm371_vm10 = vweird.f32 %v348_v22 }
 0x1c0   :  { %v353_v27 = vsub.f32 1.0, %v352_v24  ;;  %v237_v28 = vadd.f32 %v539_v46, %v236_v26 }
 0x1c1   :  { %v378_v48 = vor.u32 1.1754944e-38, %v377_v42  ;;  %vm376_vm12 = vcmp.eq.f32.partialorder %v375_v44, 8.507059e+37 }
 0x1c2   :  { %v354_v23 = vmul.f32 %v561_v21, %v353_v27  ;;  %v334_v31 = vadd.f32 %v330_v25, %v237_v28 }
 0x1c4   :  { %v563_v32 = vpop.eup %562  ;;  %v355_v33 = vadd.f32 %v561_v21, %v354_v23  ;;  %v520_v34 = vmul.f32 -1.442695, %v334_v31 }
 0x1c5   :  { %v565_v35 = vpop.eup %564  ;;  %v349_v37 = vadd.f32 1.0, %v563_v32 }
 0x1c6   :  { %v359_v38 = vsel %vm358_vm6, %v561_v21, %v355_v33  ;;  %v367_v39 = vmul.f32 %v565_v35, %v348_v22  ;;  %566 = vpow2.f32 %v520_v34  ;;  %vm372_vm9 = vweird.f32 %v565_v35 }
 0x1c7   :  { %v364_v40 = vsel %vm361_vm8, %v363_v36, %v359_v38  ;;  %568 = vrcp.f32 %v349_v37  ;;  %vm373_vm11 = vmor %vm371_vm10, %vm372_vm9  ;;  %v392_v54 = vand.u32 2147483648, %v349_v37  ;;  %v390_v56 = vand.u32 2147483647, %v349_v37 }
 0x1c8   :  { %412 = vst.msk [vmem:[%s809_s12] sm:$0xff] %vm411_vm7, %v364_v40  ;;  %v368_v41 = vsub.f32 1.0, %v367_v39  ;;  %vm386_vm14 = vweird.f32 %v349_v37 }
 0x1c9   :  { %v393_v59 = vor.u32 1.1754944e-38, %v392_v54  ;;  %vm391_vm0 = vcmp.eq.f32.partialorder %v390_v56, 8.507059e+37 }
 0x1ca   :  { %v369_v43 = vmul.f32 %v565_v35, %v368_v41 }
 0x1cc   :  { %v567_v45 = vpop.eup %566  ;;  %v370_v46 = vadd.f32 %v565_v35, %v369_v43 }
 0x1cd   :  { %v569_v47 = vpop.eup %568  ;;  %v350_v49 = vadd.f32 1.0, %v567_v45 }
 0x1ce   :  { %v374_v50 = vsel %vm373_vm11, %v565_v35, %v370_v46  ;;  %v382_v51 = vmul.f32 %v569_v47, %v349_v37  ;;  %vm387_vm13 = vweird.f32 %v569_v47 }
 0x1cf   :  { %v379_v52 = vsel %vm376_vm12, %v378_v48, %v374_v50  ;;  %570 = vrcp.f32 %v350_v49  ;;  %vm388_vm15 = vmor %vm386_vm14, %vm387_vm13  ;;  %v407_v0 = vand.u32 2147483648, %v350_v49  ;;  %v405_v2 = vand.u32 2147483647, %v350_v49 }
 0x1d0   :  { %413 = vst.msk [vmem:[%s809_s12 + $0x8] sm:$0xff] %vm411_vm7, %v379_v52  ;;  %v383_v53 = vsub.f32 1.0, %v382_v51  ;;  %vm401_vm2 = vweird.f32 %v350_v49 }
 0x1d1   :  { %v408_v4 = vor.u32 1.1754944e-38, %v407_v0  ;;  %vm406_vm4 = vcmp.eq.f32.partialorder %v405_v2, 8.507059e+37 }
 0x1d2   :  { %v384_v55 = vmul.f32 %v569_v47, %v383_v53 }
 0x1d4   :  { %v385_v57 = vadd.f32 %v569_v47, %v384_v55 }
 0x1d5   :  { %v571_v58 = vpop.eup %570 }
 0x1d6   :  { %v389_v60 = vsel %vm388_vm15, %v569_v47, %v385_v57  ;;  %v397_v61 = vmul.f32 %v571_v58, %v350_v49  ;;  %vm402_vm1 = vweird.f32 %v571_v58 }
 0x1d7   :  { %v394_v62 = vsel %vm391_vm0, %v393_v59, %v389_v60  ;;  %vm403_vm3 = vmor %vm401_vm2, %vm402_vm1 }
 0x1d8   :  { %414 = vst.msk [vmem:[%s809_s12 + $0x10] sm:$0xff] %vm411_vm7, %v394_v62  ;;  %v398_v63 = vsub.f32 1.0, %v397_v61 }
 0x1da   :  { %v399_v1 = vmul.f32 %v571_v58, %v398_v63 }
 0x1dc   :  { %v400_v3 = vadd.f32 %v571_v58, %v399_v1 }
 0x1de   :  { %v404_v6 = vsel %vm403_vm3, %v571_v58, %v400_v3 }
 0x1df   :  { %v409_v7 = vsel %vm406_vm4, %v408_v4, %v404_v6 }
 0x1e0   :  { %415 = vst.msk [vmem:[%s809_s12 + $0x18] sm:$0xff] %vm411_vm7, %v409_v7 }
 0x1e1   :  { %478 = vsyncpa [#allocation3], 1 }

</bundles_post_ra>
